<compile_context>
chip_gen: v7x
topology: tpu7x:2x2x1
jax: 0.10.0
libtpu: 0.0.40
codegen_flags: <defaults>
</compile_context>

<pallas_src>
import jax
import jax.numpy as jnp
from jax.experimental import pallas as pl
from jax.experimental.pallas import tpu as pltpu


def fused_kernel(x_ref, wb_ref, o_ref):
    # x_ref : (K=3, N=3) f32 in VMEM, x[k, n] == x1[0, k, n]  (permute folded)
    # wb_ref: (8,)  f32 in SMEM: [W00, W01, W02, W10, W11, W12, b0, b1]
    #         (row-major flatten of torch weight (O=2, K=3), then bias (2,))
    # o_ref : (1,1) f32 in SMEM (scalar result)
    x = x_ref[...]                 # single (8,128)-padded vreg; valid (3, 3)
    xk0 = x[0:1, :]                # (1, N), row k = 0
    xk1 = x[1:2, :]
    xk2 = x[2:3, :]

    # Unrolled VPU contraction: y_o[n] = sum_k x[k, n] * W[o, k] + b[o]; relu.
    y0 = xk0 * wb_ref[0] + xk1 * wb_ref[1] + xk2 * wb_ref[2] + wb_ref[6]
    y1 = xk0 * wb_ref[3] + xk1 * wb_ref[4] + xk2 * wb_ref[5] + wb_ref[7]
    y0 = jnp.maximum(y0, 0.0)      # v3[:, :, 0]
    y1 = jnp.maximum(y1, 0.0)      # v3[:, :, 1]

    # v2 = max over output features -> (1, N)
    v2 = jnp.maximum(y0, y1)

    # softmax over N (torch's implicit dim=1 for the 2-D (B, N) tensor);
    # exact divide (EUP-approx reciprocal saving is unmeasurable at N=3).
    m = jnp.max(v2, axis=-1, keepdims=True)
    e = jnp.exp(v2 - m)
    sm = e / jnp.sum(e, axis=-1, keepdims=True)

    # result = sum(v3) + sum(softmax(v2)), fused into a single XLU reduce.
    o_ref[0, 0] = jnp.sum(y0 + y1 + sm)


@jax.jit
def model_forward(x1, weight, bias):
    # Fold permute(0, 2, 1) into kernel indexing; squeeze the B=1 batch dim.
    x2d = x1[0].astype(jnp.float32)                          # (K=3, N=3)
    wb = jnp.concatenate(
        [weight.reshape(-1), bias.reshape(-1)]).astype(jnp.float32)  # (8,)

    out = pl.pallas_call(
        fused_kernel,
        out_shape=jax.ShapeDtypeStruct((1, 1), jnp.float32),
        in_specs=[
            pl.BlockSpec(memory_space=pltpu.VMEM),    # x tile
            pl.BlockSpec(memory_space=pltpu.SMEM),    # weight+bias scalars
        ],
        out_specs=pl.BlockSpec(memory_space=pltpu.SMEM),
    )(x2d, wb)
    return out[0, 0]


if __name__ == "__main__":
    key = jax.random.PRNGKey(0)
    k_x, k_w, k_b = jax.random.split(key, 3)

    # input consistent with the module: x1 ~ (1, 3, 3)
    x1 = jax.random.normal(k_x, (1, 3, 3), dtype=jnp.float32)

    # deterministic nn.Linear(3, 2)-style init: U(-1/sqrt(in), 1/sqrt(in))
    in_features, out_features = 3, 2
    bound = 1.0 / jnp.sqrt(jnp.float32(in_features))
    weight = jax.random.uniform(
        k_w, (out_features, in_features), jnp.float32, -bound, bound)
    bias = jax.random.uniform(
        k_b, (out_features,), jnp.float32, -bound, bound)

    result = model_forward(x1, weight, bias)
    jax.block_until_ready(result)

    # pure-JAX reference (exact division in-kernel -> tight tolerance)
    v1 = jnp.transpose(x1, (0, 2, 1))
    v3 = jax.nn.relu(jnp.einsum("bnk,ok->bno", v1, weight) + bias)
    v2 = jnp.max(v3, axis=-1)
    x2 = jax.nn.softmax(v2, axis=1)
    ref = jnp.sum(v3) + jnp.sum(x2)
    assert jnp.allclose(result, ref, rtol=1e-4, atol=1e-4), (result, ref)

    print("KERNEL_OK")
</pallas_src>

<mosaic_0001>
module attributes {stable_mosaic.version = 11 : i64} {
  func.func @fused_kernel(%arg0: memref<3x3xf32, #tpu.memory_space<vmem>>, %arg1: memref<8xf32, #tpu.memory_space<smem>>, %arg2: memref<1x1xf32, #tpu.memory_space<smem>>) attributes {dimension_semantics = [], scalar_prefetch = 0 : i64, scratch_operands = 0 : i64, tpu.core_type = #tpu.core_type<tc>} {
    %c0 = arith.constant 0 : index
    %c0_0 = arith.constant 0 : index
    %0 = vector.load %arg0[%c0, %c0_0] : memref<3x3xf32, #tpu.memory_space<vmem>>, vector<3x3xf32>
    %1 = vector.extract_strided_slice %0 {offsets = [0, 0], sizes = [1, 3], strides = [1, 1]} : vector<3x3xf32> to vector<1x3xf32>
    %2 = vector.extract_strided_slice %0 {offsets = [1, 0], sizes = [1, 3], strides = [1, 1]} : vector<3x3xf32> to vector<1x3xf32>
    %3 = vector.extract_strided_slice %0 {offsets = [2, 0], sizes = [1, 3], strides = [1, 1]} : vector<3x3xf32> to vector<1x3xf32>
    %c0_1 = arith.constant 0 : index
    %4 = memref.load %arg1[%c0_1] : memref<8xf32, #tpu.memory_space<smem>>
    %5 = vector.broadcast %4 : f32 to vector<1x3xf32>
    %6 = arith.mulf %1, %5 : vector<1x3xf32>
    %c1 = arith.constant 1 : index
    %7 = memref.load %arg1[%c1] : memref<8xf32, #tpu.memory_space<smem>>
    %8 = vector.broadcast %7 : f32 to vector<1x3xf32>
    %9 = arith.mulf %2, %8 : vector<1x3xf32>
    %10 = arith.addf %6, %9 : vector<1x3xf32>
    %c2 = arith.constant 2 : index
    %11 = memref.load %arg1[%c2] : memref<8xf32, #tpu.memory_space<smem>>
    %12 = vector.broadcast %11 : f32 to vector<1x3xf32>
    %13 = arith.mulf %3, %12 : vector<1x3xf32>
    %14 = arith.addf %10, %13 : vector<1x3xf32>
    %c6 = arith.constant 6 : index
    %15 = memref.load %arg1[%c6] : memref<8xf32, #tpu.memory_space<smem>>
    %16 = vector.broadcast %15 : f32 to vector<1x3xf32>
    %17 = arith.addf %14, %16 : vector<1x3xf32>
    %c3 = arith.constant 3 : index
    %18 = memref.load %arg1[%c3] : memref<8xf32, #tpu.memory_space<smem>>
    %19 = vector.broadcast %18 : f32 to vector<1x3xf32>
    %20 = arith.mulf %1, %19 : vector<1x3xf32>
    %c4 = arith.constant 4 : index
    %21 = memref.load %arg1[%c4] : memref<8xf32, #tpu.memory_space<smem>>
    %22 = vector.broadcast %21 : f32 to vector<1x3xf32>
    %23 = arith.mulf %2, %22 : vector<1x3xf32>
    %24 = arith.addf %20, %23 : vector<1x3xf32>
    %c5 = arith.constant 5 : index
    %25 = memref.load %arg1[%c5] : memref<8xf32, #tpu.memory_space<smem>>
    %26 = vector.broadcast %25 : f32 to vector<1x3xf32>
    %27 = arith.mulf %3, %26 : vector<1x3xf32>
    %28 = arith.addf %24, %27 : vector<1x3xf32>
    %c7 = arith.constant 7 : index
    %29 = memref.load %arg1[%c7] : memref<8xf32, #tpu.memory_space<smem>>
    %30 = vector.broadcast %29 : f32 to vector<1x3xf32>
    %31 = arith.addf %28, %30 : vector<1x3xf32>
    %cst = arith.constant 0.000000e+00 : f32
    %32 = vector.broadcast %cst : f32 to vector<1x3xf32>
    %33 = arith.maximumf %17, %32 : vector<1x3xf32>
    %cst_2 = arith.constant 0.000000e+00 : f32
    %34 = vector.broadcast %cst_2 : f32 to vector<1x3xf32>
    %35 = arith.maximumf %31, %34 : vector<1x3xf32>
    %36 = arith.maximumf %33, %35 : vector<1x3xf32>
    %cst_3 = arith.constant dense<0xFF800000> : vector<1xf32>
    %37 = vector.multi_reduction <maximumf>, %36, %cst_3 [1] : vector<1x3xf32> to vector<1xf32>
    %38 = vector.shape_cast %37 : vector<1xf32> to vector<1x1xf32>
    %39 = vector.broadcast %38 : vector<1x1xf32> to vector<1x3xf32>
    %40 = arith.subf %36, %39 : vector<1x3xf32>
    %41 = math.exp %40 : vector<1x3xf32>
    %cst_4 = arith.constant dense<0.000000e+00> : vector<1xf32>
    %42 = vector.multi_reduction <add>, %41, %cst_4 [1] : vector<1x3xf32> to vector<1xf32>
    %43 = vector.shape_cast %42 : vector<1xf32> to vector<1x1xf32>
    %44 = vector.broadcast %43 : vector<1x1xf32> to vector<1x3xf32>
    %45 = arith.divf %41, %44 : vector<1x3xf32>
    %46 = arith.addf %33, %35 : vector<1x3xf32>
    %47 = arith.addf %46, %45 : vector<1x3xf32>
    %48 = vector.shape_cast %47 : vector<1x3xf32> to vector<1x1x3xf32>
    %cst_5 = arith.constant dense<0.000000e+00> : vector<1xf32>
    %49 = vector.multi_reduction <add>, %48, %cst_5 [1, 2] : vector<1x1x3xf32> to vector<1xf32>
    %50 = vector.shape_cast %49 : vector<1xf32> to vector<1x1x1xf32>
    %51 = vector.extract %50[0, 0, 0] : f32 from vector<1x1x1xf32>
    %c0_6 = arith.constant 0 : index
    %c0_7 = arith.constant 0 : index
    %52 = memref.load %arg2[%c0_6, %c0_7] : memref<1x1xf32, #tpu.memory_space<smem>>
    memref.store %51, %arg2[%c0_6, %c0_7] : memref<1x1xf32, #tpu.memory_space<smem>>
    return
  }
}

</mosaic_0001>

<bundles_post_ra>
// kernel: model_forward.1
= control target key start
LH: loop header
LB: loop body
LE: loop exit
PB: predicated region body
PF: predicated region fallthrough
CT: control target
= control target key end

     0   :  { %7 = vsyncpa [#allocation4], 0  ;;  %s188_s0 = inlined_call_operand.vmem [shape: f32[3,3], index: 0, kind: input, shape index: {}]   ;;  %s189_s1 = inlined_call_operand.vmem [shape: f32[8], index: 1, kind: input, shape index: {}]   ;;  %s190_s2 = inlined_call_operand.hbm [shape: f32[1,1], index: 2, kind: output, shape index: {}]  }
   0x1   :  { %8 = vsyncpa [#allocation3], 0  ;;  %s17_s11 = sshll.u32 %s189_s1, 4  ;;  %s18_s11 = int_to_ptr.vmem [resolvable:$true] %s17_s11 }
   0x2   :  { %s124_s12 = scalar_lea.vmem %s18_s11, 16  ;;  %p129_p1 = scmp.lt.s32.totalorder %s18_s11, %s18_s11 }
   0x3   :  { %p125_p0 = scmp.ne.s32.totalorder %s18_s11, %s124_s12  ;;  %p130_p2 = scmp.lt.s32.totalorder %s124_s12, %s124_s12 }
   0x5   :  { %p131_p3 = por %p130_p2, %p129_p1 }
   0x7   :  { %p132_p4 = pnand %p131_p3, %p125_p0 }
   0x9   :  { %135 = shalt.err (!%p132_p4)
}
   0xa   :  { %s150_s13 = smov [#allocation2]  }
   0xb   :  { %20 = dma.vmem_to_smem %s18_s11, 16, %s150_s13, [#allocation4]  }
   0xc   :  { %146 = dma.done.wait [#allocation4], 16  }
   0xd   :  { %147 = vsyncadd [#allocation4], 4294967280 }
   0xe   :  { %24 = sfence }
   0xf   :  { %s26_s14 = sld [smem:[#allocation2]]  ;;  %s109_s15 = sld [smem:[#allocation2 + $0x1]]  ;;  %v25_v0 = vld [vmem:[%s188_s0] sm:$0x7]  ;;  %vm69_vm0 = vcmask 16384  }
  0x10   :  { %s110_s16 = sld [smem:[#allocation2 + $0x2]]  ;;  %s112_s17 = sld [smem:[#allocation2 + $0x3]] }
  0x11   :  { %s113_s18 = sld [smem:[#allocation2 + $0x4]]  ;;  %s114_s19 = sld [smem:[#allocation2 + $0x5]] }
  0x12   :  { %s111_s21 = sld [smem:[#allocation2 + $0x6]]  ;;  %s115_s22 = sld [smem:[#allocation2 + $0x7]] }
  0x13   :  { %s136_s25 = scalar_lea.hbm %s190_s2, 16 }
  0x14   :  { %p137_p5 = scmp.ne.s32.totalorder %s190_s2, %s136_s25  ;;  %p140_p6 = scmp.lt.u32.totalorder %s136_s25, %s190_s2 }
  0x15   :  { %v27_v1 = vstv %s26_s14  ;;  %v30_v2 = vstv %s109_s15 }
  0x16   :  { %v28_v3 = vmul.f32 %v27_v1, %v25_v0  ;;  %v31_v4 = vmul.f32 %v30_v2, %v25_v0  ;;  %v37_v5 = vstv %s110_s16  ;;  %v47_v7 = vstv %s112_s17  ;;  %p142_p7 = pnand %p140_p6, %p137_p5 }
  0x17   :  { %v38_v6 = vmul.f32 %v37_v5, %v25_v0  ;;  %v50_v8 = vstv %s113_s18  ;;  %v48_v10 = vmul.f32 %v47_v7, %v25_v0  ;;  %v57_v12 = vstv %s114_s19 }
  0x18   :  { %v33_v9 = vrot.slane %v31_v4, 1  ;;  %v51_v11 = vmul.f32 %v50_v8, %v25_v0  ;;  %v58_v14 = vmul.f32 %v57_v12, %v25_v0  ;;  %v44_v17 = vstv %s111_s21 }
  0x19   :  { %v40_v13 = vrot.slane %v38_v6, 2  ;;  %v64_v21 = vstv %s115_s22 }
  0x1a   :  { %v35_v15 = vadd.f32 %v33_v9, %v28_v3  ;;  %v53_v16 = vrot.slane %v51_v11, 1  ;;  %v60_v18 = vrot.slane %v58_v14, 2 }
  0x1c   :  { %v42_v19 = vadd.f32 %v40_v13, %v35_v15  ;;  %v55_v20 = vadd.f32 %v53_v16, %v48_v10 }
  0x1e   :  { %v45_v22 = vadd.f32 %v44_v17, %v42_v19  ;;  %v62_v23 = vadd.f32 %v60_v18, %v55_v20 }
  0x20   :  { %v65_v24 = vadd.f32 %v64_v21, %v62_v23  ;;  %v66_v25 = vmax.f32 %v45_v22, 0.0 }
  0x22   :  { %v67_v26 = vmax.f32 %v65_v24, 0.0 }
  0x24   :  { %v68_v27 = vmax.f32 %v66_v25, %v67_v26  ;;  %v81_v35 = vadd.f32 %v67_v26, %v66_v25 }
  0x26   :  { %v70_v28 = vsel %vm69_vm0, %v68_v27, -inf }
  0x27   :  { %71 = vmax.xlane.f32.xlu0 %v70_v28 }
  0xb4   :  { %v72_v29 = vpop.xlane.xlu0 %71 }
  0xb5   :  { %v73_v30 = vsub.f32 %v68_v27, %v72_v29 }
  0xb7   :  { %v74_v31 = vmul.f32 1.442695, %v73_v30 }
  0xb9   :  { %120 = vpow2.f32 %v74_v31 }
  0xc3   :  { %v121_v32 = vpop.eup %120 }
  0xc4   :  { %v76_v33 = vsel %vm69_vm0, %v121_v32, 0.0 }
  0xc5   :  { %77 = vadd.xlane.f32.xlu0 %v76_v33 }
 0x152   :  { %v78_v34 = vpop.xlane.xlu0 %77 }
 0x153   :  { %122 = vrcp.f32 %v78_v34 }
 0x15d   :  { %v123_v36 = vpop.eup %122 }
 0x15e   :  { %v80_v37 = vmul.f32 %v123_v36, %v121_v32 }
 0x160   :  { %v82_v38 = vadd.f32 %v81_v35, %v80_v37 }
 0x162   :  { %v83_v39 = vsel %vm69_vm0, %v82_v38, 0.0 }
 0x163   :  { %84 = vadd.xlane.f32.xlu1 %v83_v39 }
 0x1f0   :  { %v85_v40 = vpop.xlane.xlu1 %84 }
 0x1f1   :  { %v86_v41 = vrot.slane %v85_v40, 4 }
 0x1f3   :  { %v87_v42 = vadd.f32 %v86_v41, %v85_v40 }
 0x1f5   :  { %v88_v43 = vrot.slane %v87_v42, 2 }
 0x1f7   :  { %v89_v44 = vadd.f32 %v88_v43, %v87_v42 }
 0x1f9   :  { %v90_v45 = vrot.slane %v89_v44, 1 }
 0x1fb   :  { %v91_v46 = vadd.f32 %v90_v45, %v89_v44 }
 0x1fd   :  { %116 = vpush %v91_v46 }
 0x22e   :  { %s117_s0 = spop %116 }
 0x22f   :  { %94 = sst [smem:[#allocation5]] %s117_s0 }
 0x230   :  { %145 = shalt.err (!%p142_p7)
}
 0x231   :  { %s151_s30 = smov [#allocation5]  }
 0x232   :  { %102 = dma.smem_to_hbm %s151_s30, 16, %s190_s2, [#allocation3]  }
 0x233   :  { %148 = dma.done.wait [#allocation3], 16  }
 0x234   :  { %149 = vsyncadd [#allocation3], 4294967280 }
 0x235   :  { %106 = sfence }
 0x236   :  { %107 = vsyncpa [#allocation3], 1 }
 0x237   :  { %108 = vsyncpa [#allocation4], 1 }

</bundles_post_ra>
